<compile_context>
chip_gen: v7x
topology: tpu7x:2x2x1
jax: 0.10.0
libtpu: 0.0.40
codegen_flags: <defaults>
</compile_context>

<pallas_src>
import jax
import jax.numpy as jnp
from jax import lax
from jax.experimental import pallas as pl
from jax.experimental.pallas import tpu as pltpu

_LANE = 128
_MIB = 1024 * 1024

# Per-grid-step x-tile footprint targets (in input-dtype bytes).
_TILE_TARGET_BYTES = 2 * _MIB     # grow NB/THW until roughly this big
_TILE_CAP_BYTES = 4 * _MIB        # never exceed this per tile
_MAX_THW = 2048                   # keeps the unrolled lane-chunk loop short
# Fused single-read path: x + y + f32 temporaries must fit in VMEM with
# headroom even on v7x (64 MiB physical VMEM, 32 MiB default scoped limit).
_FUSED_NEED_CAP = 28 * _MIB


def _vmem_limit(estimate_bytes):
    """Explicit scoped-VMEM limit: estimate + margin, never below 32 MiB."""
    return int(min(max(estimate_bytes + 4 * _MIB, 32 * _MIB), 100 * _MIB))


def _choose_tiling(N, C, HW, x_dsize):
    """VMEM-budget-aware tiling -> (num_cblk, c_blk, num_hw, thw, num_nb, nb)."""
    # Channel blocking: two sublane-aligned channel blocks give the stats pass
    # a race-free megacore-parallel axis on v7x (no effect on v5e/v6e).
    if C % 16 == 0:
        num_cblk, c_blk = 2, C // 2
    else:
        num_cblk, c_blk = 1, C

    # HW tile: lane-dense (multiple of 128) and within the per-tile byte cap.
    if HW % _LANE != 0:
        thw = HW                       # full-extent block (layout exception)
    else:
        thw = _LANE
        while (thw * 2 <= min(HW, _MAX_THW) and HW % (thw * 2) == 0
               and c_blk * (thw * 2) * x_dsize <= _TILE_CAP_BYTES):
            thw *= 2
    num_hw = HW // thw

    # Batch blocking: pack batch elements per grid step so small-C tiles still
    # amortize the ~0.35us/step overhead and keep per-channel DMA bursts long.
    nb = 1
    while (nb * 2 <= N and N % (nb * 2) == 0
           and (nb * 2) * c_blk * thw * x_dsize <= _TILE_TARGET_BYTES):
        nb *= 2
    num_nb = N // nb

    return num_cblk, c_blk, num_hw, thw, num_nb, nb


def _make_stats_kernel(momentum, eps, inv_count, thw, chunked):
    """Pass 1: per-channel-block batch stats + momentum blend + scale/shift."""
    m = float(momentum)
    n_chunks = thw // _LANE if chunked else 0

    def kernel(x_ref, rm_ref, rv_ref, w_ref, b_ref,
               mu_ref, sig_ref, scale_ref, shift_ref,
               sum_sc, sq_sc):
        n = pl.program_id(1)
        h = pl.program_id(2)

        @pl.when(jnp.logical_and(n == 0, h == 0))
        def _():
            sum_sc[...] = jnp.zeros_like(sum_sc)
            sq_sc[...] = jnp.zeros_like(sq_sc)

        rm = rm_ref[...]                                     # (c_blk, 1) f32
        nb, c_blk = x_ref.shape[0], x_ref.shape[1]

        if chunked:
            # Shifted (x - running_mean) lane-wide accumulation: pure VPU adds
            # per 128-lane chunk; the cross-lane (XLU) reduce is deferred to
            # the final grid step.  Also avoids E[x^2]-E[x]^2 cancellation.
            rm_b = jnp.broadcast_to(rm, (nb, c_blk, _LANE))   # hoisted once
            s1 = sum_sc[...]
            s2 = sq_sc[...]
            for j in range(n_chunks):
                sl = slice(j * _LANE, (j + 1) * _LANE)
                xs = x_ref[:, :, sl].astype(jnp.float32) - rm_b
                s1 = s1 + jnp.sum(xs, axis=0)
                s2 = s2 + jnp.sum(xs * xs, axis=0)
            sum_sc[...] = s1
            sq_sc[...] = s2
        else:
            x = x_ref[...].astype(jnp.float32)               # (nb, c_blk, thw)
            xs = x - rm[None, :, :]
            sum_sc[...] += jnp.sum(jnp.sum(xs, axis=0), axis=1, keepdims=True)
            sq_sc[...] += jnp.sum(jnp.sum(xs * xs, axis=0), axis=1,
                                  keepdims=True)

        is_last = jnp.logical_and(n == pl.num_programs(1) - 1,
                                  h == pl.num_programs(2) - 1)

        @pl.when(is_last)
        def _():
            inv_cnt = jnp.float32(inv_count)
            # Single deferred cross-lane reduce of the lane-wide accumulators.
            s1 = jnp.sum(sum_sc[...], axis=1, keepdims=True)   # (c_blk, 1)
            s2 = jnp.sum(sq_sc[...], axis=1, keepdims=True)
            d_mean = s1 * inv_cnt                    # E[x] - running_mean
            b_mean = rm + d_mean
            b_var = jnp.maximum(s2 * inv_cnt - d_mean * d_mean, 0.0)

            mean = (1.0 - m) * rm + m * b_mean
            var = (1.0 - m) * rv_ref[...] + m * b_var

            inv_std = lax.rsqrt(var + jnp.float32(eps))
            scale = inv_std * w_ref[...]
            shift = b_ref[...] - mean * scale

            mu_ref[...] = mean
            sig_ref[...] = var
            # Lane-replicated scale/shift -> lane-dense stores here and plain
            # vreg reuse in pass 2.
            scale_ref[...] = jnp.broadcast_to(scale, tuple(scale_ref.shape))
            shift_ref[...] = jnp.broadcast_to(shift, tuple(shift_ref.shape))

    return kernel


def _make_norm_kernel(thw, chunked):
    """Pass 2: y = x * scale + shift (2 VPU ops/element, lane-dense stores)."""
    n_chunks = thw // _LANE if chunked else 0

    def kernel(x_ref, scale_ref, shift_ref, o_ref):
        nb = x_ref.shape[0]
        if chunked:
            # Lane-replicated (c_blk, 128) scale/shift: broadcast once, reuse
            # across all lane chunks (no per-chunk broadcast_in_dim).
            scale = jnp.broadcast_to(scale_ref[...],
                                     (nb,) + tuple(scale_ref.shape))
            shift = jnp.broadcast_to(shift_ref[...],
                                     (nb,) + tuple(shift_ref.shape))
            for j in range(n_chunks):
                sl = slice(j * _LANE, (j + 1) * _LANE)
                x = x_ref[:, :, sl].astype(jnp.float32)
                o_ref[:, :, sl] = (x * scale + shift).astype(o_ref.dtype)
        else:
            x = x_ref[...].astype(jnp.float32)
            scale = scale_ref[...][None, :, :]
            shift = shift_ref[...][None, :, :]
            o_ref[...] = (x * scale + shift).astype(o_ref.dtype)

    return kernel


def _make_fused_kernel(momentum, eps, inv_count):
    """Single-pass path (whole tensor VMEM-resident): one HBM read of x."""
    m = float(momentum)

    def kernel(x_ref, rm_ref, rv_ref, w_ref, b_ref, y_ref, mu_ref, sig_ref):
        x = x_ref[...].astype(jnp.float32)                   # (N, C, HW)
        rm = rm_ref[...]                                     # (C, 1)
        xs = x - rm[None, :, :]
        s1 = jnp.sum(jnp.sum(xs, axis=0), axis=1, keepdims=True)      # (C, 1)
        s2 = jnp.sum(jnp.sum(xs * xs, axis=0), axis=1, keepdims=True)

        inv_cnt = jnp.float32(inv_count)
        d_mean = s1 * inv_cnt
        b_mean = rm + d_mean
        b_var = jnp.maximum(s2 * inv_cnt - d_mean * d_mean, 0.0)

        mean = (1.0 - m) * rm + m * b_mean
        var = (1.0 - m) * rv_ref[...] + m * b_var

        inv_std = lax.rsqrt(var + jnp.float32(eps))
        scale = inv_std * w_ref[...]
        shift = b_ref[...] - mean * scale

        y_ref[...] = (x * scale[None, :, :] + shift[None, :, :]).astype(
            y_ref.dtype)
        mu_ref[...] = mean
        sig_ref[...] = var

    return kernel


def momentum_bn_forward(x_nchw, running_mean, running_var, weight, bias,
                        momentum=0.1, eps=1e-5, force_two_pass=False):
    """MomentumBN forward. x_nchw: (N, C, H, W). Returns (y_nchw, mu, sigma)."""
    N, C, H, W = x_nchw.shape
    HW = H * W
    x3 = x_nchw.reshape(N, C, HW)          # free view; channels -> sublanes
    x_dsize = x3.dtype.itemsize
    x_bytes = N * C * HW * x_dsize
    xf32_bytes = N * C * HW * 4
    elems = N * C * HW
    inv_count = 1.0 / float(N * HW)

    rm = running_mean.reshape(C, 1).astype(jnp.float32)
    rv = running_var.reshape(C, 1).astype(jnp.float32)
    w = weight.reshape(C, 1).astype(jnp.float32)
    b = bias.reshape(C, 1).astype(jnp.float32)

    # -------- Fused single-read path (small activations). --------
    fused_need = 2 * x_bytes + 3 * xf32_bytes + _MIB
    if (not force_two_pass) and fused_need <= _FUSED_NEED_CAP:
        y3, mu, sigma = pl.pallas_call(
            _make_fused_kernel(momentum, eps, inv_count),
            out_shape=(jax.ShapeDtypeStruct((N, C, HW), x_nchw.dtype),
                       jax.ShapeDtypeStruct((C, 1), jnp.float32),
                       jax.ShapeDtypeStruct((C, 1), jnp.float32)),
            compiler_params=pltpu.CompilerParams(
                vmem_limit_bytes=_vmem_limit(fused_need)),
            cost_estimate=pl.CostEstimate(
                flops=int(5 * elems), transcendentals=int(C),
                bytes_accessed=int(2 * x_bytes)),
        )(x3, rm, rv, w, b)
        return y3.reshape(N, C, H, W), mu.reshape(C), sigma.reshape(C)

    # -------- Two-pass HBM-roofline pipeline. --------
    num_cblk, c_blk, num_hw, thw, num_nb, nb = _choose_tiling(N, C, HW, x_dsize)
    chunked = (thw % _LANE == 0)
    acc_lanes = _LANE if chunked else 1
    lane_out = acc_lanes

    # VMEM footprint estimates (double-buffered tiles + temps + scratch).
    x_tile_bytes = nb * c_blk * thw * x_dsize
    y_tile_bytes = nb * c_blk * thw * x_dsize
    chunk_f32 = nb * c_blk * _LANE * 4
    tile_f32 = nb * c_blk * thw * 4
    temps = 3 * (chunk_f32 if chunked else tile_f32)
    vec_bytes = 2 * (4 * c_blk * 4 + 2 * c_blk * 4 + 2 * c_blk * lane_out * 4)
    scratch_bytes = 2 * c_blk * acc_lanes * 4
    pass1_need = 2 * x_tile_bytes + vec_bytes + scratch_bytes + temps + _MIB
    pass2_need = (2 * x_tile_bytes + 2 * y_tile_bytes
                  + 2 * (2 * c_blk * lane_out * 4) + temps + _MIB)

    x_spec = pl.BlockSpec((nb, c_blk, thw), lambda c, n, h: (n, c, h))
    vec_spec = pl.BlockSpec((c_blk, 1), lambda c, n, h: (c, 0))
    wide_spec = pl.BlockSpec((c_blk, lane_out), lambda c, n, h: (c, 0))
    grid = (num_cblk, num_nb, num_hw)

    # ---- Pass 1: per-channel stats. Channel-block axis "parallel" (megacore
    # on v7x, each core owns disjoint channels and its own scratch); the
    # (N, HW) reduction axes stay "arbitrary". ----
    mu, sigma, scale, shift = pl.pallas_call(
        _make_stats_kernel(momentum, eps, inv_count, thw, chunked),
        out_shape=(
            jax.ShapeDtypeStruct((C, 1), jnp.float32),
            jax.ShapeDtypeStruct((C, 1), jnp.float32),
            jax.ShapeDtypeStruct((C, lane_out), jnp.float32),
            jax.ShapeDtypeStruct((C, lane_out), jnp.float32),
        ),
        grid=grid,
        in_specs=[x_spec, vec_spec, vec_spec, vec_spec, vec_spec],
        out_specs=(vec_spec, vec_spec, wide_spec, wide_spec),
        scratch_shapes=[pltpu.VMEM((c_blk, acc_lanes), jnp.float32),
                        pltpu.VMEM((c_blk, acc_lanes), jnp.float32)],
        compiler_params=pltpu.CompilerParams(
            dimension_semantics=("parallel", "arbitrary", "arbitrary"),
            vmem_limit_bytes=_vmem_limit(pass1_need)),
        cost_estimate=pl.CostEstimate(
            flops=int(4 * elems), transcendentals=int(C),
            bytes_accessed=int(x_bytes)),
    )(x3, rm, rv, w, b)

    # ---- Pass 2: y = x*scale + shift; all axes independent -> "parallel". ----
    y3 = pl.pallas_call(
        _make_norm_kernel(thw, chunked),
        out_shape=jax.ShapeDtypeStruct((N, C, HW), x_nchw.dtype),
        grid=grid,
        in_specs=[x_spec, wide_spec, wide_spec],
        out_specs=x_spec,
        compiler_params=pltpu.CompilerParams(
            dimension_semantics=("parallel", "parallel", "parallel"),
            vmem_limit_bytes=_vmem_limit(pass2_need)),
        cost_estimate=pl.CostEstimate(
            flops=int(2 * elems), transcendentals=0,
            bytes_accessed=int(2 * x_bytes)),
    )(x3, scale, shift)

    return y3.reshape(N, C, H, W), mu.reshape(C), sigma.reshape(C)


def _reference(x, running_mean, running_var, weight, bias, momentum, eps):
    b_mean = jnp.mean(x, axis=(0, 2, 3))
    b_var = jnp.mean((x - b_mean[None, :, None, None]) ** 2, axis=(0, 2, 3))
    mean = (1 - momentum) * running_mean + momentum * b_mean
    var = (1 - momentum) * running_var + momentum * b_var
    y = ((x - mean[None, :, None, None])
         / jnp.sqrt(var[None, :, None, None] + eps)
         * weight[None, :, None, None] + bias[None, :, None, None])
    return y, mean, var


def _run_case(key, shape, momentum, eps, force_two_pass):
    N, C, H, W = shape
    kx, krm, krv, kw, kb = jax.random.split(key, 5)
    x = jax.random.normal(kx, (N, C, H, W), dtype=jnp.float32)
    running_mean = jax.random.normal(krm, (C,), dtype=jnp.float32) * 0.1
    running_var = jax.random.uniform(krv, (C,), dtype=jnp.float32,
                                     minval=0.5, maxval=1.5)
    weight = jax.random.uniform(kw, (C,), dtype=jnp.float32,
                                minval=0.5, maxval=1.5)
    bias = jax.random.normal(kb, (C,), dtype=jnp.float32) * 0.1

    y, mu, sigma = momentum_bn_forward(x, running_mean, running_var, weight,
                                       bias, momentum, eps,
                                       force_two_pass=force_two_pass)
    jax.block_until_ready((y, mu, sigma))

    y_ref, mu_ref, sig_ref = _reference(x, running_mean, running_var, weight,
                                        bias, momentum, eps)
    assert jnp.allclose(y, y_ref, atol=1e-4, rtol=1e-4)
    assert jnp.allclose(mu, mu_ref, atol=1e-4, rtol=1e-4)
    assert jnp.allclose(sigma, sig_ref, atol=1e-4, rtol=1e-4)


if __name__ == "__main__":
    key = jax.random.PRNGKey(0)
    k0, k1, k2 = jax.random.split(key, 3)
    momentum, eps = 0.1, 1e-5

    # Small shape from the spec (BatchNorm2d usage): fused VMEM-resident path.
    _run_case(k0, (2, 4, 16, 16), momentum, eps, force_two_pass=False)
    # Two-pass path: channel-blocked (megacore) stats + chunked lane-dense normalize.
    _run_case(k1, (4, 32, 16, 16), momentum, eps, force_two_pass=True)
    # Two-pass fallback: H*W not a multiple of 128.
    _run_case(k2, (2, 8, 7, 7), momentum, eps, force_two_pass=True)

    # TODO(synk): running-stat buffer mutation / num_batches_tracked bookkeeping
    # is framework state, not kernel compute; blended mu/sigma are returned instead.
    print("KERNEL_OK")
</pallas_src>

<mosaic_0001>
module attributes {stable_mosaic.version = 11 : i64} {
  func.func @kernel(%arg0: memref<2x4x256xf32, #tpu.memory_space<vmem>>, %arg1: memref<4x1xf32, #tpu.memory_space<vmem>>, %arg2: memref<4x1xf32, #tpu.memory_space<vmem>>, %arg3: memref<4x1xf32, #tpu.memory_space<vmem>>, %arg4: memref<4x1xf32, #tpu.memory_space<vmem>>, %arg5: memref<2x4x256xf32, #tpu.memory_space<vmem>>, %arg6: memref<4x1xf32, #tpu.memory_space<vmem>>, %arg7: memref<4x1xf32, #tpu.memory_space<vmem>>) attributes {dimension_semantics = [], scalar_prefetch = 0 : i64, scratch_operands = 0 : i64, tpu.core_type = #tpu.core_type<tc>} {
    %c0 = arith.constant 0 : index
    %c0_0 = arith.constant 0 : index
    %c0_1 = arith.constant 0 : index
    %0 = vector.load %arg0[%c0, %c0_0, %c0_1] : memref<2x4x256xf32, #tpu.memory_space<vmem>>, vector<2x4x256xf32>
    %c0_2 = arith.constant 0 : index
    %c0_3 = arith.constant 0 : index
    %1 = vector.load %arg1[%c0_2, %c0_3] : memref<4x1xf32, #tpu.memory_space<vmem>>, vector<4x1xf32>
    %2 = vector.shape_cast %1 : vector<4x1xf32> to vector<1x4x1xf32>
    %3 = vector.broadcast %2 : vector<1x4x1xf32> to vector<2x4x256xf32>
    %4 = arith.subf %0, %3 : vector<2x4x256xf32>
    %cst = arith.constant dense<0.000000e+00> : vector<4x256xf32>
    %5 = vector.multi_reduction <add>, %4, %cst [0] : vector<2x4x256xf32> to vector<4x256xf32>
    %cst_4 = arith.constant dense<0.000000e+00> : vector<4xf32>
    %6 = vector.multi_reduction <add>, %5, %cst_4 [1] : vector<4x256xf32> to vector<4xf32>
    %7 = vector.shape_cast %6 : vector<4xf32> to vector<4x1xf32>
    %8 = arith.mulf %4, %4 : vector<2x4x256xf32>
    %cst_5 = arith.constant dense<0.000000e+00> : vector<4x256xf32>
    %9 = vector.multi_reduction <add>, %8, %cst_5 [0] : vector<2x4x256xf32> to vector<4x256xf32>
    %cst_6 = arith.constant dense<0.000000e+00> : vector<4xf32>
    %10 = vector.multi_reduction <add>, %9, %cst_6 [1] : vector<4x256xf32> to vector<4xf32>
    %11 = vector.shape_cast %10 : vector<4xf32> to vector<4x1xf32>
    %cst_7 = arith.constant 0.001953125 : f32
    %12 = vector.broadcast %cst_7 : f32 to vector<4x1xf32>
    %13 = arith.mulf %7, %12 : vector<4x1xf32>
    %14 = arith.addf %1, %13 : vector<4x1xf32>
    %cst_8 = arith.constant 0.001953125 : f32
    %15 = vector.broadcast %cst_8 : f32 to vector<4x1xf32>
    %16 = arith.mulf %11, %15 : vector<4x1xf32>
    %17 = arith.mulf %13, %13 : vector<4x1xf32>
    %18 = arith.subf %16, %17 : vector<4x1xf32>
    %cst_9 = arith.constant 0.000000e+00 : f32
    %19 = vector.broadcast %cst_9 : f32 to vector<4x1xf32>
    %20 = arith.maximumf %18, %19 : vector<4x1xf32>
    %cst_10 = arith.constant 0.899999976 : f32
    %21 = vector.broadcast %cst_10 : f32 to vector<4x1xf32>
    %22 = arith.mulf %21, %1 : vector<4x1xf32>
    %cst_11 = arith.constant 1.000000e-01 : f32
    %23 = vector.broadcast %cst_11 : f32 to vector<4x1xf32>
    %24 = arith.mulf %23, %14 : vector<4x1xf32>
    %25 = arith.addf %22, %24 : vector<4x1xf32>
    %c0_12 = arith.constant 0 : index
    %c0_13 = arith.constant 0 : index
    %26 = vector.load %arg2[%c0_12, %c0_13] : memref<4x1xf32, #tpu.memory_space<vmem>>, vector<4x1xf32>
    %cst_14 = arith.constant 0.899999976 : f32
    %27 = vector.broadcast %cst_14 : f32 to vector<4x1xf32>
    %28 = arith.mulf %27, %26 : vector<4x1xf32>
    %cst_15 = arith.constant 1.000000e-01 : f32
    %29 = vector.broadcast %cst_15 : f32 to vector<4x1xf32>
    %30 = arith.mulf %29, %20 : vector<4x1xf32>
    %31 = arith.addf %28, %30 : vector<4x1xf32>
    %cst_16 = arith.constant 9.99999974E-6 : f32
    %32 = vector.broadcast %cst_16 : f32 to vector<4x1xf32>
    %33 = arith.addf %31, %32 : vector<4x1xf32>
    %34 = math.rsqrt %33 : vector<4x1xf32>
    %c0_17 = arith.constant 0 : index
    %c0_18 = arith.constant 0 : index
    %35 = vector.load %arg3[%c0_17, %c0_18] : memref<4x1xf32, #tpu.memory_space<vmem>>, vector<4x1xf32>
    %36 = arith.mulf %34, %35 : vector<4x1xf32>
    %c0_19 = arith.constant 0 : index
    %c0_20 = arith.constant 0 : index
    %37 = vector.load %arg4[%c0_19, %c0_20] : memref<4x1xf32, #tpu.memory_space<vmem>>, vector<4x1xf32>
    %38 = arith.mulf %25, %36 : vector<4x1xf32>
    %39 = arith.subf %37, %38 : vector<4x1xf32>
    %40 = vector.shape_cast %36 : vector<4x1xf32> to vector<1x4x1xf32>
    %41 = vector.broadcast %40 : vector<1x4x1xf32> to vector<2x4x256xf32>
    %42 = arith.mulf %0, %41 : vector<2x4x256xf32>
    %43 = vector.shape_cast %39 : vector<4x1xf32> to vector<1x4x1xf32>
    %44 = vector.broadcast %43 : vector<1x4x1xf32> to vector<2x4x256xf32>
    %45 = arith.addf %42, %44 : vector<2x4x256xf32>
    %c0_21 = arith.constant 0 : index
    %c0_22 = arith.constant 0 : index
    %c0_23 = arith.constant 0 : index
    %46 = vector.load %arg5[%c0_21, %c0_22, %c0_23] : memref<2x4x256xf32, #tpu.memory_space<vmem>>, vector<2x4x256xf32>
    tpu.vector_store %arg5[%c0_21, %c0_22, %c0_23], %45 {strides = array<i32>} : memref<2x4x256xf32, #tpu.memory_space<vmem>>, vector<2x4x256xf32>,
    %c0_24 = arith.constant 0 : index
    %c0_25 = arith.constant 0 : index
    %47 = vector.load %arg6[%c0_24, %c0_25] : memref<4x1xf32, #tpu.memory_space<vmem>>, vector<4x1xf32>
    tpu.vector_store %arg6[%c0_24, %c0_25], %25 {strides = array<i32>} : memref<4x1xf32, #tpu.memory_space<vmem>>, vector<4x1xf32>,
    %c0_26 = arith.constant 0 : index
    %c0_27 = arith.constant 0 : index
    %48 = vector.load %arg7[%c0_26, %c0_27] : memref<4x1xf32, #tpu.memory_space<vmem>>, vector<4x1xf32>
    tpu.vector_store %arg7[%c0_26, %c0_27], %31 {strides = array<i32>} : memref<4x1xf32, #tpu.memory_space<vmem>>, vector<4x1xf32>,
    return
  }
}

</mosaic_0001>

<bundles_post_ra>
// kernel: tpu_custom_call.1
= control target key start
LH: loop header
LB: loop body
LE: loop exit
PB: predicated region body
PF: predicated region fallthrough
CT: control target
= control target key end

     0   :  { %v188_v1 = vmov 0   ;;  %s294_s0 = inlined_call_operand.vmem [shape: f32[2,4,256], index: 0, kind: input, shape index: {}]   ;;  %s295_s1 = inlined_call_operand.vmem [shape: f32[4,1], index: 1, kind: input, shape index: {}]   ;;  %s296_s2 = inlined_call_operand.vmem [shape: f32[4,1], index: 2, kind: input, shape index: {}]   ;;  %s297_s3 = inlined_call_operand.vmem [shape: f32[4,1], index: 3, kind: input, shape index: {}]   ;;  %s298_s4 = inlined_call_operand.vmem [shape: f32[4,1], index: 4, kind: input, shape index: {}]   ;;  %s299_s5 = inlined_call_operand.hbm [shape: f32[2,4,256], index: 5, kind: output, shape index: {0}]   ;;  %s300_s6 = inlined_call_operand.vmem [shape: f32[4,1], index: 6, kind: output, shape index: {1}]   ;;  %s301_s7 = inlined_call_operand.vmem [shape: f32[4,1], index: 7, kind: output, shape index: {2}]  }
   0x1   :  { %v26_v0 = vld [vmem:[%s295_s1] sm:$0xf]  ;;  %160 = vset.pattern.permute.xlu0 %v188_v1  ;;  %161 = vset.pattern.permute.xlu1 %v188_v1 }
   0x2   :  { %13 = vsyncpa [#allocation3], 0  ;;  %29 = vperm.xlu0 %160, %v26_v0   ;;  %v189_v2 = vmov 839922192   ;;  %v34_v4 = vlaneseq  ;;  %v241_v9 = vld [vmem:[%s294_s0] sm:$0xff]  ;;  %v246_v10 = vld [vmem:[%s294_s0 + $0x8] sm:$0xff] }
   0x3   :  { %v32_v3 = vunpack.c.l.s4 %v189_v2  ;;  %vm47_vm0 = vcmask 1043456   ;;  %v84_v40 = vmul.f32 0.9, %v26_v0  ;;  %v87_v46 = vld [vmem:[%s296_s2] sm:$0xf]  ;;  %vm128_vm1 = vcmask 3072  }
   0x4   :  { %v35_v6 = vshrl.u32 %v34_v4, 7  ;;  %v88_v49 = vmul.f32 0.9, %v87_v46  ;;  %v93_v54 = vld [vmem:[%s297_s3] sm:$0xf] }
   0x5   :  { %v33_v5 = vunpack.c.0.s8 %v32_v3  ;;  %v95_v57 = vld [vmem:[%s298_s4] sm:$0xf] }
   0x7   :  { %v236_v7 = vsub.s32 %v33_v5, %v35_v6 }
  0x81   :  { %v30_v8 = vpop.permute.xlu0 %29 }
  0x82   :  { %v37_v11 = vrot.slane %v30_v8, %v236_v7 }
  0x84   :  { %v39_v12 = vsub.f32 %v241_v9, %v37_v11  ;;  %v40_v13 = vsub.f32 %v246_v10, %v37_v11 }
  0x86   :  { %v43_v14 = vcombine.high %v39_v12, %v39_v12  ;;  %v44_v15 = vcombine.high %v40_v13, %v40_v13  ;;  %v48_v16 = vsel %vm47_vm0, %v39_v12, 0.0  ;;  %v49_v17 = vsel %vm47_vm0, %v40_v13, 0.0 }
  0x87   :  { %v50_v18 = vadd.f32 %v49_v17, %v48_v16  ;;  %v59_v19 = vmul.f32 %v39_v12, %v39_v12  ;;  %v60_v20 = vmul.f32 %v40_v13, %v40_v13 }
  0x88   :  { %v51_v21 = vsel %vm47_vm0, %v43_v14, 0.0  ;;  %v52_v22 = vsel %vm47_vm0, %v44_v15, 0.0 }
  0x89   :  { %v53_v23 = vadd.f32 %v52_v22, %v51_v21  ;;  %v63_v24 = vcombine.high %v59_v19, %v59_v19  ;;  %v64_v25 = vcombine.high %v60_v20, %v60_v20  ;;  %v54_v26 = vsel %vm47_vm0, %v50_v18, 0.0 }
  0x8a   :  { %v67_v27 = vsel %vm47_vm0, %v59_v19, 0.0  ;;  %v68_v28 = vsel %vm47_vm0, %v60_v20, 0.0 }
  0x8b   :  { %v55_v29 = vsel %vm47_vm0, %v53_v23, 0.0  ;;  %v69_v30 = vadd.f32 %v68_v28, %v67_v27  ;;  %v70_v31 = vsel %vm47_vm0, %v63_v24, 0.0  ;;  %v71_v32 = vsel %vm47_vm0, %v64_v25, 0.0 }
  0x8c   :  { %v56_v33 = vadd.f32 %v55_v29, %v54_v26  ;;  %v72_v34 = vadd.f32 %v71_v32, %v70_v31 }
  0x8d   :  { %v73_v35 = vsel %vm47_vm0, %v69_v30, 0.0 }
  0x8e   :  { %57 = vadd.xlane.f32.xlu0 %v56_v33  ;;  %v74_v36 = vsel %vm47_vm0, %v72_v34, 0.0 }
  0x8f   :  { %v75_v37 = vadd.f32 %v74_v36, %v73_v35 }
  0x91   :  { %76 = vadd.xlane.f32.xlu1 %v75_v37 }
 0x11b   :  { %v58_v38 = vpop.xlane.xlu0 %57 }
 0x11c   :  { %v78_v39 = vmul.f32 0.001953125, %v58_v38 }
 0x11e   :  { %v79_v41 = vadd.f32 %v78_v39, %v26_v0  ;;  %v81_v42 = vmul.f32 %v78_v39, %v78_v39  ;;  %v77_v43 = vpop.xlane.xlu1 %76 }
 0x11f   :  { %v80_v44 = vmul.f32 0.001953125, %v77_v43 }
 0x120   :  { %v85_v45 = vmul.f32 0.1, %v79_v41 }
 0x121   :  { %v82_v47 = vsub.f32 %v80_v44, %v81_v42 }
 0x122   :  { %v86_v48 = vadd.f32 %v85_v45, %v84_v40 }
 0x123   :  { %v83_v50 = vmax.f32 %v82_v47, 0.0 }
 0x124   :  { %129 = vst.msk [vmem:[%s300_s6] sm:$0xf] %vm128_vm1, %v86_v48  ;;  %s190_s6 = smov [#allocation2]  }
 0x125   :  { %v89_v51 = vmul.f32 0.1, %v83_v50 }
 0x127   :  { %v90_v52 = vadd.f32 %v89_v51, %v88_v49 }
 0x129   :  { %v91_v53 = vadd.f32 1e-05, %v90_v52  ;;  %130 = vst.msk [vmem:[%s301_s7] sm:$0xf] %vm128_vm1, %v90_v52  ;;  %s136_s7 = sshll.u32 %s190_s6, 4  ;;  %s137_s7 = int_to_ptr.vmem [resolvable:$true] %s136_s7 }
 0x12a   :  { %s164_s3 = scalar_lea.vmem %s137_s7, 256  ;;  %p169_p1 = scmp.lt.s32.totalorder %s137_s7, %s137_s7 }
 0x12b   :  { %162 = vrsqrt.f32 %v91_v53  ;;  %p165_p0 = scmp.ne.s32.totalorder %s137_s7, %s164_s3  ;;  %p170_p2 = scmp.lt.s32.totalorder %s164_s3, %s164_s3 }
 0x12d   :  { %p171_p3 = por %p170_p2, %p169_p1 }
 0x12f   :  { %p172_p4 = pnand %p171_p3, %p165_p0 }
 0x135   :  { %v163_v55 = vpop.eup %162 }
 0x136   :  { %v94_v56 = vmul.f32 %v163_v55, %v93_v54 }
 0x138   :  { %100 = vperm.xlu1 %161, %v94_v56   ;;  %v96_v58 = vmul.f32 %v94_v56, %v86_v48 }
 0x13a   :  { %v97_v59 = vsub.f32 %v95_v57, %v96_v58 }
 0x13c   :  { %114 = vperm.xlu1 %161, %v97_v59  }
 0x1b7   :  { %v101_v60 = vpop.permute.xlu1 %100 }
 0x1b8   :  { %v108_v61 = vrot.slane %v101_v60, %v236_v7 }
 0x1ba   :  { %v110_v63 = vmul.f32 %v108_v61, %v241_v9  ;;  %v111_v0 = vmul.f32 %v108_v61, %v246_v10 }
 0x1bb   :  { %v115_v62 = vpop.permute.xlu1 %114 }
 0x1bc   :  { %v122_v1 = vrot.slane %v115_v62, %v236_v7 }
 0x1be   :  { %v124_v2 = vadd.f32 %v122_v1, %v110_v63  ;;  %v125_v3 = vadd.f32 %v122_v1, %v111_v0 }
 0x1c0   :  { %126 = vst [vmem:[#allocation2] sm:$0xff] %v124_v2  ;;  %127 = vst [vmem:[#allocation2 + $0x8] sm:$0xff] %v125_v3 }
 0x1c1   :  { %175 = shalt.err (!%p172_p4)
}
 0x1c2   :  { %s176_s15 = scalar_lea.hbm %s299_s5, 256 }
 0x1c3   :  { %p177_p5 = scmp.ne.s32.totalorder %s299_s5, %s176_s15  ;;  %p180_p6 = scmp.lt.u32.totalorder %s176_s15, %s299_s5 }
 0x1c5   :  { %p182_p7 = pnand %p180_p6, %p177_p5 }
 0x1c7   :  { %185 = shalt.err (!%p182_p7)
}
 0x1c8   :  { %s191_s20 = smov 128   ;;  %s192_s21 = smov 8  }
 0x1c9   :  { %142 = dma.vmem_to_hbm [thread:$0]  %s137_s7, 256, %s299_s5, [#allocation3], %s191_s20, %s191_s20, %s192_s21  }
 0x1ca   :  { %186 = dma.done.wait [#allocation3], 256  }
 0x1cb   :  { %187 = vsyncadd [#allocation3], 4294967040 }
 0x1cc   :  { %154 = vsyncpa [#allocation3], 1 }

</bundles_post_ra>
